<compile_context>
chip_gen: v7x
topology: tpu7x:2x2x1
jax: 0.10.0
libtpu: 0.0.40
codegen_flags: <defaults>
</compile_context>

<pallas_src>
import jax
import jax.numpy as jnp
from jax.experimental import pallas as pl
from jax.experimental.pallas import tpu as pltpu

INPUT_DIM = 2
INDEX_DIM = 1
Y_DIM = 1
HIDDEN = 128
IN_FEATS = INPUT_DIM + INDEX_DIM + Y_DIM  # 4
LANE = 128
TM_MAX = 1024  # row tile (multiple of 8); sweepable 512-2048, fits all VMEM budgets


def _round_up(x, m):
    return ((x + m - 1) // m) * m


def _swish(x):
    # torch.sigmoid(x) * x, computed in f32 (v5e VPU/EUP has no bf16 path).
    return x * jax.nn.sigmoid(x)


def mlp_kernel(h_ref, w1_ref, b1_ref, w2_ref, b2_ref, w3_ref, b3_ref,
               w4_ref, b4_ref, o_ref):
    # h_ref: (TM, 4) f32 -- raw [x, t, y] features, no lane padding in HBM.
    h = h_ref[...]
    w1 = w1_ref[...]  # (4, 128) f32

    # Layer 1 (K=4): 4 rank-1 broadcast-FMAs on the VPU (avoids a padded,
    # 97%-zero MXU matmul and keeps the MXU free for the hidden layers).
    z1 = h[:, 0:1] * w1[0:1, :] + b1_ref[...]
    for k in range(1, IN_FEATS):
        z1 = z1 + h[:, k:k + 1] * w1[k:k + 1, :]
    a1 = _swish(z1)  # f32 (TM, 128)

    # Layers 2/3: bf16 MXU matmuls with f32 accumulation; swish stays f32.
    z2 = jnp.dot(a1.astype(jnp.bfloat16), w2_ref[...],
                 preferred_element_type=jnp.float32) + b2_ref[...]
    a2 = _swish(z2)
    z3 = jnp.dot(a2.astype(jnp.bfloat16), w3_ref[...],
                 preferred_element_type=jnp.float32) + b3_ref[...]
    a3 = _swish(z3)  # f32 (TM, 128)

    # Layer 4: hidden -> 2. w4 is lane-padded to 128 in VMEM (one-time, tiny),
    # f32 dot for accuracy; only the 2 real lanes are written back to HBM.
    z4 = jnp.dot(a3, w4_ref[...], preferred_element_type=jnp.float32)
    o_ref[...] = (z4[:, :INPUT_DIM] + b4_ref[...]).astype(o_ref.dtype)


@jax.jit
def mlp_forward(x, t, y, params):
    """Pallas implementation of MLP.forward(input, t, y)."""
    sz = x.shape
    x2 = x.reshape(-1, INPUT_DIM).astype(jnp.float32)
    t2 = t.reshape(-1, INDEX_DIM).astype(jnp.float32)
    y2 = y.reshape(-1, Y_DIM).astype(jnp.float32)
    h = jnp.concatenate([x2, t2, y2], axis=1)  # (N, 4) -- only 16 B/row in HBM

    n = h.shape[0]
    tm = min(TM_MAX, _round_up(n, 8))
    n_pad = _round_up(n, tm)
    h_pad = jnp.pad(h, ((0, n_pad - n), (0, 0)))

    (w1, b1, w2, b2, w3, b3, w4, b4) = params
    w1f = w1.astype(jnp.float32)                              # (4, 128)
    w2b = w2.astype(jnp.bfloat16)                             # (128, 128) bf16
    w3b = w3.astype(jnp.bfloat16)                             # (128, 128) bf16
    w4p = jnp.zeros((HIDDEN, LANE), jnp.float32).at[:, :INPUT_DIM].set(
        w4.astype(jnp.float32))                               # (128, 128) lane-padded
    b1r = b1.reshape(1, HIDDEN).astype(jnp.float32)
    b2r = b2.reshape(1, HIDDEN).astype(jnp.float32)
    b3r = b3.reshape(1, HIDDEN).astype(jnp.float32)
    b4r = b4.reshape(1, INPUT_DIM).astype(jnp.float32)

    full = lambda i: (0, 0)  # weights/biases: whole-array block, fetched once
    grid = (n_pad // tm,)

    out_pad = pl.pallas_call(
        mlp_kernel,
        out_shape=jax.ShapeDtypeStruct((n_pad, INPUT_DIM), jnp.float32),
        grid_spec=pltpu.PrefetchScalarGridSpec(
            num_scalar_prefetch=0,
            grid=grid,
            in_specs=[
                pl.BlockSpec((tm, IN_FEATS), lambda i: (i, 0)),   # h (TM, 4)
                pl.BlockSpec((IN_FEATS, HIDDEN), full),           # w1 (4, 128)
                pl.BlockSpec((1, HIDDEN), full),                  # b1
                pl.BlockSpec((HIDDEN, HIDDEN), full),             # w2 (bf16)
                pl.BlockSpec((1, HIDDEN), full),                  # b2
                pl.BlockSpec((HIDDEN, HIDDEN), full),             # w3 (bf16)
                pl.BlockSpec((1, HIDDEN), full),                  # b3
                pl.BlockSpec((HIDDEN, LANE), full),               # w4 (lane-padded)
                pl.BlockSpec((1, INPUT_DIM), full),               # b4 (1, 2)
            ],
            out_specs=pl.BlockSpec((tm, INPUT_DIM), lambda i: (i, 0)),
        ),
        compiler_params=pltpu.CompilerParams(
            dimension_semantics=("parallel",),
            vmem_limit_bytes=32 * 1024 * 1024),
    )(h_pad, w1f, b1r, w2b, b2r, w3b, b3r, w4p, b4r)

    return out_pad[:n].reshape(sz)


def init_params(key):
    """Deterministic parameter init matching nn.Linear shapes (stored as (in, out))."""
    ks = jax.random.split(key, 8)

    def lin(kw, kb, fan_in, fan_out):
        bound = 1.0 / jnp.sqrt(fan_in)
        w = jax.random.uniform(kw, (fan_in, fan_out), jnp.float32, -bound, bound)
        b = jax.random.uniform(kb, (fan_out,), jnp.float32, -bound, bound)
        return w, b

    w1, b1 = lin(ks[0], ks[1], IN_FEATS, HIDDEN)
    w2, b2 = lin(ks[2], ks[3], HIDDEN, HIDDEN)
    w3, b3 = lin(ks[4], ks[5], HIDDEN, HIDDEN)
    w4, b4 = lin(ks[6], ks[7], HIDDEN, INPUT_DIM)
    return (w1, b1, w2, b2, w3, b3, w4, b4)


def mlp_ref(x, t, y, params):
    """Pure-JAX f32 reference for correctness check."""
    sz = x.shape
    x2 = x.reshape(-1, INPUT_DIM).astype(jnp.float32)
    t2 = t.reshape(-1, INDEX_DIM).astype(jnp.float32)
    y2 = y.reshape(-1, Y_DIM).astype(jnp.float32)
    h = jnp.concatenate([x2, t2, y2], axis=1)
    (w1, b1, w2, b2, w3, b3, w4, b4) = params
    a = _swish(h @ w1 + b1)
    a = _swish(a @ w2 + b2)
    a = _swish(a @ w3 + b3)
    out = a @ w4 + b4
    return out.reshape(sz)


if __name__ == "__main__":
    key = jax.random.PRNGKey(0)
    kp, kx, kt, ky = jax.random.split(key, 4)

    params = init_params(kp)

    # (2, 5, 2) -> 10 rows, exercises the reshape/view path and row padding (10 -> 16)
    x = jax.random.normal(kx, (2, 5, INPUT_DIM), jnp.float32)
    t = jax.random.uniform(kt, (2, 5), jnp.float32)
    y = jax.random.normal(ky, (2, 5), jnp.float32)

    out = mlp_forward(x, t, y, params)
    jax.block_until_ready(out)

    ref = mlp_ref(x, t, y, params)
    assert out.shape == x.shape
    # bf16 MXU matmuls (f32 accumulation) -> loosened tolerance vs the f32 reference.
    assert jnp.allclose(out, ref, atol=2e-2, rtol=2e-2), float(
        jnp.max(jnp.abs(out - ref)))

    print("KERNEL_OK")
</pallas_src>

<mosaic_0001>
module attributes {stable_mosaic.version = 11 : i64} {
  func.func @mlp_kernel(%arg0: i32, %arg1: memref<16x4xf32, #tpu.memory_space<vmem>>, %arg2: memref<4x128xf32, #tpu.memory_space<vmem>>, %arg3: memref<1x128xf32, #tpu.memory_space<vmem>>, %arg4: memref<128x128xbf16, #tpu.memory_space<vmem>>, %arg5: memref<1x128xf32, #tpu.memory_space<vmem>>, %arg6: memref<128x128xbf16, #tpu.memory_space<vmem>>, %arg7: memref<1x128xf32, #tpu.memory_space<vmem>>, %arg8: memref<128x128xf32, #tpu.memory_space<vmem>>, %arg9: memref<1x2xf32, #tpu.memory_space<vmem>>, %arg10: memref<16x2xf32, #tpu.memory_space<vmem>>) attributes {dimension_semantics = [#tpu.dimension_semantics<parallel>], iteration_bounds = array<i64: 1>, scalar_prefetch = 0 : i64, scratch_operands = 0 : i64, tpu.core_type = #tpu.core_type<tc>, window_params = [{transform_indices = @transform_0, window_bounds = array<i64: 16, 4>}, {pipeline_mode = #tpu.pipeline_mode<synchronous>, transform_indices = @transform_1, window_bounds = array<i64: 4, 128>}, {pipeline_mode = #tpu.pipeline_mode<synchronous>, transform_indices = @transform_2, window_bounds = array<i64: 1, 128>}, {pipeline_mode = #tpu.pipeline_mode<synchronous>, transform_indices = @transform_3, window_bounds = array<i64: 128, 128>}, {pipeline_mode = #tpu.pipeline_mode<synchronous>, transform_indices = @transform_4, window_bounds = array<i64: 1, 128>}, {pipeline_mode = #tpu.pipeline_mode<synchronous>, transform_indices = @transform_5, window_bounds = array<i64: 128, 128>}, {pipeline_mode = #tpu.pipeline_mode<synchronous>, transform_indices = @transform_6, window_bounds = array<i64: 1, 128>}, {pipeline_mode = #tpu.pipeline_mode<synchronous>, transform_indices = @transform_7, window_bounds = array<i64: 128, 128>}, {pipeline_mode = #tpu.pipeline_mode<synchronous>, transform_indices = @transform_8, window_bounds = array<i64: 1, 2>}, {transform_indices = @transform_9, window_bounds = array<i64: 16, 2>}]} {
    %c0 = arith.constant 0 : index
    %c0_0 = arith.constant 0 : index
    %0 = vector.load %arg1[%c0, %c0_0] : memref<16x4xf32, #tpu.memory_space<vmem>>, vector<16x4xf32>
    %c0_1 = arith.constant 0 : index
    %c0_2 = arith.constant 0 : index
    %1 = vector.load %arg2[%c0_1, %c0_2] : memref<4x128xf32, #tpu.memory_space<vmem>>, vector<4x128xf32>
    %2 = vector.extract_strided_slice %0 {offsets = [0, 0], sizes = [16, 1], strides = [1, 1]} : vector<16x4xf32> to vector<16x1xf32>
    %3 = vector.extract_strided_slice %1 {offsets = [0, 0], sizes = [1, 128], strides = [1, 1]} : vector<4x128xf32> to vector<1x128xf32>
    %4 = vector.broadcast %2 : vector<16x1xf32> to vector<16x128xf32>
    %5 = vector.broadcast %3 : vector<1x128xf32> to vector<16x128xf32>
    %6 = arith.mulf %4, %5 : vector<16x128xf32>
    %c0_3 = arith.constant 0 : index
    %c0_4 = arith.constant 0 : index
    %7 = vector.load %arg3[%c0_3, %c0_4] : memref<1x128xf32, #tpu.memory_space<vmem>>, vector<1x128xf32>
    %8 = vector.broadcast %7 : vector<1x128xf32> to vector<16x128xf32>
    %9 = arith.addf %6, %8 : vector<16x128xf32>
    %10 = vector.extract_strided_slice %0 {offsets = [0, 1], sizes = [16, 1], strides = [1, 1]} : vector<16x4xf32> to vector<16x1xf32>
    %11 = vector.extract_strided_slice %1 {offsets = [1, 0], sizes = [1, 128], strides = [1, 1]} : vector<4x128xf32> to vector<1x128xf32>
    %12 = vector.broadcast %10 : vector<16x1xf32> to vector<16x128xf32>
    %13 = vector.broadcast %11 : vector<1x128xf32> to vector<16x128xf32>
    %14 = arith.mulf %12, %13 : vector<16x128xf32>
    %15 = arith.addf %9, %14 : vector<16x128xf32>
    %16 = vector.extract_strided_slice %0 {offsets = [0, 2], sizes = [16, 1], strides = [1, 1]} : vector<16x4xf32> to vector<16x1xf32>
    %17 = vector.extract_strided_slice %1 {offsets = [2, 0], sizes = [1, 128], strides = [1, 1]} : vector<4x128xf32> to vector<1x128xf32>
    %18 = vector.broadcast %16 : vector<16x1xf32> to vector<16x128xf32>
    %19 = vector.broadcast %17 : vector<1x128xf32> to vector<16x128xf32>
    %20 = arith.mulf %18, %19 : vector<16x128xf32>
    %21 = arith.addf %15, %20 : vector<16x128xf32>
    %22 = vector.extract_strided_slice %0 {offsets = [0, 3], sizes = [16, 1], strides = [1, 1]} : vector<16x4xf32> to vector<16x1xf32>
    %23 = vector.extract_strided_slice %1 {offsets = [3, 0], sizes = [1, 128], strides = [1, 1]} : vector<4x128xf32> to vector<1x128xf32>
    %24 = vector.broadcast %22 : vector<16x1xf32> to vector<16x128xf32>
    %25 = vector.broadcast %23 : vector<1x128xf32> to vector<16x128xf32>
    %26 = arith.mulf %24, %25 : vector<16x128xf32>
    %27 = arith.addf %21, %26 : vector<16x128xf32>
    %28 = arith.negf %27 : vector<16x128xf32>
    %29 = math.exp %28 : vector<16x128xf32>
    %cst = arith.constant 1.000000e+00 : f32
    %30 = vector.broadcast %cst : f32 to vector<16x128xf32>
    %31 = arith.addf %30, %29 : vector<16x128xf32>
    %32 = arith.divf %30, %31 : vector<16x128xf32>
    %33 = arith.mulf %27, %32 : vector<16x128xf32>
    %34 = arith.truncf %33 : vector<16x128xf32> to vector<16x128xbf16>
    %c0_5 = arith.constant 0 : index
    %c0_6 = arith.constant 0 : index
    %35 = vector.load %arg4[%c0_5, %c0_6] : memref<128x128xbf16, #tpu.memory_space<vmem>>, vector<128x128xbf16>
    %cst_7 = arith.constant dense<0.000000e+00> : vector<16x128xf32>
    %36 = tpu.matmul %34, %35, %cst_7 {dimension_numbers = #tpu.dot_dimension_numbers<[1], [0], [0], [1], [0, 0, 1, 1], [], []>} : vector<16x128xbf16>, vector<128x128xbf16>, vector<16x128xf32> -> vector<16x128xf32>
    %c0_8 = arith.constant 0 : index
    %c0_9 = arith.constant 0 : index
    %37 = vector.load %arg5[%c0_8, %c0_9] : memref<1x128xf32, #tpu.memory_space<vmem>>, vector<1x128xf32>
    %38 = vector.broadcast %37 : vector<1x128xf32> to vector<16x128xf32>
    %39 = arith.addf %36, %38 : vector<16x128xf32>
    %40 = arith.negf %39 : vector<16x128xf32>
    %41 = math.exp %40 : vector<16x128xf32>
    %cst_10 = arith.constant 1.000000e+00 : f32
    %42 = vector.broadcast %cst_10 : f32 to vector<16x128xf32>
    %43 = arith.addf %42, %41 : vector<16x128xf32>
    %44 = arith.divf %42, %43 : vector<16x128xf32>
    %45 = arith.mulf %39, %44 : vector<16x128xf32>
    %46 = arith.truncf %45 : vector<16x128xf32> to vector<16x128xbf16>
    %c0_11 = arith.constant 0 : index
    %c0_12 = arith.constant 0 : index
    %47 = vector.load %arg6[%c0_11, %c0_12] : memref<128x128xbf16, #tpu.memory_space<vmem>>, vector<128x128xbf16>
    %cst_13 = arith.constant dense<0.000000e+00> : vector<16x128xf32>
    %48 = tpu.matmul %46, %47, %cst_13 {dimension_numbers = #tpu.dot_dimension_numbers<[1], [0], [0], [1], [0, 0, 1, 1], [], []>} : vector<16x128xbf16>, vector<128x128xbf16>, vector<16x128xf32> -> vector<16x128xf32>
    %c0_14 = arith.constant 0 : index
    %c0_15 = arith.constant 0 : index
    %49 = vector.load %arg7[%c0_14, %c0_15] : memref<1x128xf32, #tpu.memory_space<vmem>>, vector<1x128xf32>
    %50 = vector.broadcast %49 : vector<1x128xf32> to vector<16x128xf32>
    %51 = arith.addf %48, %50 : vector<16x128xf32>
    %52 = arith.negf %51 : vector<16x128xf32>
    %53 = math.exp %52 : vector<16x128xf32>
    %cst_16 = arith.constant 1.000000e+00 : f32
    %54 = vector.broadcast %cst_16 : f32 to vector<16x128xf32>
    %55 = arith.addf %54, %53 : vector<16x128xf32>
    %56 = arith.divf %54, %55 : vector<16x128xf32>
    %57 = arith.mulf %51, %56 : vector<16x128xf32>
    %c0_17 = arith.constant 0 : index
    %c0_18 = arith.constant 0 : index
    %58 = vector.load %arg8[%c0_17, %c0_18] : memref<128x128xf32, #tpu.memory_space<vmem>>, vector<128x128xf32>
    %cst_19 = arith.constant dense<0.000000e+00> : vector<16x128xf32>
    %59 = tpu.matmul %57, %58, %cst_19 {dimension_numbers = #tpu.dot_dimension_numbers<[1], [0], [0], [1], [0, 0, 1, 1], [], []>} : vector<16x128xf32>, vector<128x128xf32>, vector<16x128xf32> -> vector<16x128xf32>
    %60 = vector.extract_strided_slice %59 {offsets = [0, 0], sizes = [16, 2], strides = [1, 1]} : vector<16x128xf32> to vector<16x2xf32>
    %c0_20 = arith.constant 0 : index
    %c0_21 = arith.constant 0 : index
    %61 = vector.load %arg9[%c0_20, %c0_21] : memref<1x2xf32, #tpu.memory_space<vmem>>, vector<1x2xf32>
    %62 = vector.broadcast %61 : vector<1x2xf32> to vector<16x2xf32>
    %63 = arith.addf %60, %62 : vector<16x2xf32>
    %c0_22 = arith.constant 0 : index
    %c0_23 = arith.constant 0 : index
    %64 = vector.load %arg10[%c0_22, %c0_23] : memref<16x2xf32, #tpu.memory_space<vmem>>, vector<16x2xf32>
    tpu.vector_store %arg10[%c0_22, %c0_23], %63 {strides = array<i32>} : memref<16x2xf32, #tpu.memory_space<vmem>>, vector<16x2xf32>,
    return
  }
  func.func @transform_0(%arg0: i32) -> (i32, i32) {
    %c0_i32 = arith.constant 0 : i32
    %c0_i32_0 = arith.constant 0 : i32
    return %arg0, %c0_i32 : i32, i32
  }
  func.func @transform_1(%arg0: i32) -> (i32, i32) {
    %c0_i32 = arith.constant 0 : i32
    %c0_i32_0 = arith.constant 0 : i32
    %c0_i32_1 = arith.constant 0 : i32
    return %c0_i32, %c0_i32_0 : i32, i32
  }
  func.func @transform_2(%arg0: i32) -> (i32, i32) {
    %c0_i32 = arith.constant 0 : i32
    %c0_i32_0 = arith.constant 0 : i32
    %c0_i32_1 = arith.constant 0 : i32
    return %c0_i32, %c0_i32_0 : i32, i32
  }
  func.func @transform_3(%arg0: i32) -> (i32, i32) {
    %c0_i32 = arith.constant 0 : i32
    %c0_i32_0 = arith.constant 0 : i32
    %c0_i32_1 = arith.constant 0 : i32
    return %c0_i32, %c0_i32_0 : i32, i32
  }
  func.func @transform_4(%arg0: i32) -> (i32, i32) {
    %c0_i32 = arith.constant 0 : i32
    %c0_i32_0 = arith.constant 0 : i32
    %c0_i32_1 = arith.constant 0 : i32
    return %c0_i32, %c0_i32_0 : i32, i32
  }
  func.func @transform_5(%arg0: i32) -> (i32, i32) {
    %c0_i32 = arith.constant 0 : i32
    %c0_i32_0 = arith.constant 0 : i32
    %c0_i32_1 = arith.constant 0 : i32
    return %c0_i32, %c0_i32_0 : i32, i32
  }
  func.func @transform_6(%arg0: i32) -> (i32, i32) {
    %c0_i32 = arith.constant 0 : i32
    %c0_i32_0 = arith.constant 0 : i32
    %c0_i32_1 = arith.constant 0 : i32
    return %c0_i32, %c0_i32_0 : i32, i32
  }
  func.func @transform_7(%arg0: i32) -> (i32, i32) {
    %c0_i32 = arith.constant 0 : i32
    %c0_i32_0 = arith.constant 0 : i32
    %c0_i32_1 = arith.constant 0 : i32
    return %c0_i32, %c0_i32_0 : i32, i32
  }
  func.func @transform_8(%arg0: i32) -> (i32, i32) {
    %c0_i32 = arith.constant 0 : i32
    %c0_i32_0 = arith.constant 0 : i32
    %c0_i32_1 = arith.constant 0 : i32
    return %c0_i32, %c0_i32_0 : i32, i32
  }
  func.func @transform_9(%arg0: i32) -> (i32, i32) {
    %c0_i32 = arith.constant 0 : i32
    %c0_i32_0 = arith.constant 0 : i32
    return %arg0, %c0_i32 : i32, i32
  }
}

</mosaic_0001>

<bundles_post_ra>
// kernel: mlp_forward.1
= control target key start
LH: loop header
LB: loop body
LE: loop exit
PB: predicated region body
PF: predicated region fallthrough
CT: control target
= control target key end

     0   :  { %v705_v0 = vmov 1   ;;  %v706_v1 = vmov 0   ;;  %v707_v4 = vmov 2   ;;  %v708_v5 = vmov 3   ;;  %s902_s0 = inlined_call_operand.vmem [shape: f32[16,4], index: 0, kind: input, shape index: {}]   ;;  %s903_s3 = inlined_call_operand.vmem [shape: bf16[128,128], index: 3, kind: input, shape index: {}]   ;;  %s904_s1 = inlined_call_operand.vmem [shape: f32[4,128], index: 1, kind: input, shape index: {}]   ;;  %s905_s2 = inlined_call_operand.vmem [shape: f32[1,128], index: 2, kind: input, shape index: {}]   ;;  %s906_s5 = inlined_call_operand.vmem [shape: bf16[128,128], index: 5, kind: input, shape index: {}]   ;;  %s907_s4 = inlined_call_operand.vmem [shape: f32[1,128], index: 4, kind: input, shape index: {}]   ;;  %s908_s7 = inlined_call_operand.vmem [shape: f32[128,128], index: 7, kind: input, shape index: {}]   ;;  %s909_s6 = inlined_call_operand.vmem [shape: f32[1,128], index: 6, kind: input, shape index: {}]   ;;  %s910_s8 = inlined_call_operand.vmem [shape: f32[1,2], index: 8, kind: input, shape index: {}]   ;;  %s911_s9 = inlined_call_operand.vmem [shape: f32[16,2], index: 9, kind: output, shape index: {}]  }
   0x1   :  { %660 = vset.pattern.permute.xlu1 %v705_v0  ;;  %659 = vset.pattern.permute.xlu0 %v706_v1  ;;  %v33_v2 = vld [vmem:[%s902_s0] sm:$0xff]  ;;  %v34_v3 = vld [vmem:[%s902_s0 + $0x8] sm:$0xff]  ;;  %v709_v7 = vmov 0.0   ;;  %v667_v9 = vld [vmem:[%s903_s3 + $0x10] sm:$0xff]   ;;  %vm710_vm0 = vmmov 0   ;;  %v46_v15 = vlaneseq  ;;  %vm477_vm1 = vcmask 15360  }
   0x2   :  { %62 = vperm.xlu1 %660, %v33_v2   ;;  %38 = vperm.xlu0 %659, %v33_v2   ;;  %v665_v6 = vld [vmem:[%s903_s3] sm:$0xff]   ;;  %v666_v8 = vld [vmem:[%s903_s3 + $0x8] sm:$0xff]   ;;  %v668_v10 = vld [vmem:[%s903_s3 + $0x18] sm:$0xff]  }
   0x3   :  { %546 = vmatprep.subr.bf16.mxu0 %v709_v7  ;;  %566 = vmatprep.subr.bf16.mxu1 %v709_v7  ;;  %v669_v11 = vld [vmem:[%s903_s3 + $0x20] sm:$0xff]   ;;  %v670_v12 = vld [vmem:[%s903_s3 + $0x28] sm:$0xff]   ;;  %v671_v13 = vld [vmem:[%s903_s3 + $0x30] sm:$0xff]   ;;  %v47_v16 = vshrl.u32 %v46_v15, 7 }
   0x4   :  { %547 = vmatpush3.bf16.msra.mxu0 %v665_v6  ;;  %v672_v14 = vld [vmem:[%s903_s3 + $0x38] sm:$0xff]   ;;  %562 = vmatprep.mubr.msk.bf16.mxu0 %vm710_vm0, %v709_v7  ;;  %v35_v18 = vld [vmem:[%s904_s1] sm:$0xf]  ;;  %v674_v63 = vld [vmem:[%s906_s5 + $0x8] sm:$0xff]  }
   0x5   :  { %548 = vmatprep.subr.bf16.mxu0 %v709_v7  ;;  %582 = vmatprep.mubr.msk.bf16.mxu1 %vm710_vm0, %v709_v7  ;;  %v48_v17 = vsub.s32 0, %v47_v16  ;;  %v71_v22 = vsub.s32 1, %v47_v16  ;;  %v87_v23 = vsub.s32 2, %v47_v16  ;;  %v484_v28 = vld [vmem:[%s905_s2] ss:$0 sm:$0xff]  ;;  %v103_v29 = vsub.s32 3, %v47_v16 }
   0x6   :  { %66 = vperm.xlu1 %660, %v34_v3   ;;  %43 = vperm.xlu0 %659, %v34_v3   ;;  %v673_v62 = vld [vmem:[%s906_s5] sm:$0xff]   ;;  %v675_v0 = vld [vmem:[%s906_s5 + $0x10] sm:$0xff]   ;;  %v676_v1 = vld [vmem:[%s906_s5 + $0x18] sm:$0xff]  }
   0x7   :  { %v49_v21 = vrot.slane %v35_v18, %v48_v17  ;;  %v72_v30 = vrot.slane %v35_v18, %v71_v22  ;;  %v88_v32 = vrot.slane %v35_v18, %v87_v23  ;;  %v104_v37 = vrot.slane %v35_v18, %v103_v29  ;;  %567 = vmatpush3.bf16.msra.mxu1 %v673_v62  ;;  %v487_v6 = vld [vmem:[%s907_s4] ss:$0 sm:$0xff] }
   0x8   :  { %549 = vmatpush3.bf16.msra.mxu0 %v666_v8  ;;  %568 = vmatprep.subr.bf16.mxu1 %v709_v7 }
   0x9   :  { %550 = vmatprep.subr.bf16.mxu0 %v709_v7 }
   0xa   :  { %662 = vset.pattern.permute.xlu1 %v707_v4  ;;  %661 = vset.pattern.permute.xlu0 %v707_v4  ;;  %v679_v4 = vld [vmem:[%s906_s5 + $0x30] sm:$0xff]  }
   0xb   :  { %82 = vperm.xlu1 %662, %v34_v3   ;;  %78 = vperm.xlu0 %661, %v33_v2  }
   0xc   :  { %551 = vmatpush3.bf16.msra.mxu0 %v667_v9  ;;  %569 = vmatpush3.bf16.msra.mxu1 %v674_v63 }
   0xd   :  { %552 = vmatprep.subr.bf16.mxu0 %v709_v7  ;;  %570 = vmatprep.subr.bf16.mxu1 %v709_v7 }
   0xf   :  { %663 = vset.pattern.permute.xlu1 %v708_v5  ;;  %664 = vset.pattern.permute.xlu0 %v708_v5  ;;  %v680_v5 = vld [vmem:[%s906_s5 + $0x38] sm:$0xff]  }
  0x10   :  { %94 = vperm.xlu1 %663, %v33_v2   ;;  %98 = vperm.xlu0 %664, %v34_v3   ;;  %v677_v2 = vld [vmem:[%s906_s5 + $0x20] sm:$0xff]   ;;  %v678_v3 = vld [vmem:[%s906_s5 + $0x28] sm:$0xff]  }
  0x11   :  { %553 = vmatpush3.bf16.msra.mxu0 %v668_v10  ;;  %571 = vmatpush3.bf16.msra.mxu1 %v675_v0 }
  0x12   :  { %554 = vmatprep.subr.bf16.mxu0 %v709_v7  ;;  %572 = vmatprep.subr.bf16.mxu1 %v709_v7 }
  0x15   :  { %555 = vmatpush3.bf16.msra.mxu0 %v669_v11  ;;  %573 = vmatpush3.bf16.msra.mxu1 %v676_v1  ;;  %v509_v1 = vld [vmem:[%s910_s8] ss:$0 sm:$0xff] }
  0x16   :  { %556 = vmatprep.subr.bf16.mxu0 %v709_v7  ;;  %574 = vmatprep.subr.bf16.mxu1 %v709_v7 }
  0x19   :  { %557 = vmatpush3.bf16.msra.mxu0 %v670_v12  ;;  %575 = vmatpush3.bf16.msra.mxu1 %v677_v2 }
  0x1a   :  { %558 = vmatprep.subr.bf16.mxu0 %v709_v7  ;;  %576 = vmatprep.subr.bf16.mxu1 %v709_v7 }
  0x1d   :  { %559 = vmatpush3.bf16.msra.mxu0 %v671_v13  ;;  %577 = vmatpush3.bf16.msra.mxu1 %v678_v3 }
  0x1e   :  { %560 = vmatprep.subr.bf16.mxu0 %v709_v7  ;;  %578 = vmatprep.subr.bf16.mxu1 %v709_v7 }
  0x21   :  { %561 = vmatpush3.bf16.msra.mxu0 %v672_v14  ;;  %579 = vmatpush3.bf16.msra.mxu1 %v679_v4 }
  0x22   :  { %580 = vmatprep.subr.bf16.mxu1 %v709_v7 }
  0x25   :  { %581 = vmatpush3.bf16.msra.mxu1 %v680_v5 }
  0x81   :  { %v63_v19 = vpop.permute.xlu1 %62  ;;  %v39_v20 = vpop.permute.xlu0 %38 }
  0x82   :  { %v50_v26 = vmul.f32 %v49_v21, %v39_v20  ;;  %v73_v38 = vmul.f32 %v72_v30, %v63_v19 }
  0x84   :  { %v59_v33 = vadd.f32 %v484_v28, %v50_v26 }
  0x85   :  { %v67_v24 = vpop.permute.xlu1 %66  ;;  %v44_v25 = vpop.permute.xlu0 %43 }
  0x86   :  { %v51_v27 = vmul.f32 %v49_v21, %v44_v25  ;;  %v74_v34 = vmul.f32 %v72_v30, %v67_v24  ;;  %v75_v42 = vadd.f32 %v73_v38, %v59_v33  ;;  %v377_v24 = vld [vmem:[%s908_s7] sm:$0xff]  ;;  %v378_v25 = vld [vmem:[%s908_s7 + $0x8] sm:$0xff]  ;;  %v383_v33 = vld [vmem:[%s908_s7 + $0x30] sm:$0xff] }
  0x87   :  { %v621_v26 = vpack.c.bf16 %v378_v25, %v377_v24  ;;  %v381_v30 = vld [vmem:[%s908_s7 + $0x20] sm:$0xff] }
  0x88   :  { %v60_v31 = vadd.f32 %v484_v28, %v51_v27  ;;  %v379_v27 = vld [vmem:[%s908_s7 + $0x10] sm:$0xff]  ;;  %v380_v28 = vld [vmem:[%s908_s7 + $0x18] sm:$0xff] }
  0x89   :  { %622 = vmatprep.subr.bf16.mxu0 %v621_v26  ;;  %v625_v29 = vpack.c.bf16 %v380_v28, %v379_v27 }
  0x8a   :  { %v83_v35 = vpop.permute.xlu1 %82  ;;  %v79_v36 = vpop.permute.xlu0 %78  ;;  %v76_v39 = vadd.f32 %v74_v34, %v60_v31  ;;  %v382_v31 = vld [vmem:[%s908_s7 + $0x28] sm:$0xff]  ;;  %v384_v34 = vld [vmem:[%s908_s7 + $0x38] sm:$0xff] }
  0x8b   :  { %v90_v40 = vmul.f32 %v88_v32, %v83_v35  ;;  %v89_v41 = vmul.f32 %v88_v32, %v79_v36  ;;  %v629_v32 = vpack.c.bf16 %v382_v31, %v381_v30  ;;  %v633_v35 = vpack.c.bf16 %v384_v34, %v383_v33  ;;  %v385_v36 = vld [vmem:[%s908_s7 + $0x40] sm:$0xff] }
  0x8d   :  { %v92_v45 = vadd.f32 %v90_v40, %v76_v39  ;;  %v91_v46 = vadd.f32 %v89_v41, %v75_v42  ;;  %v387_v39 = vld [vmem:[%s908_s7 + $0x50] sm:$0xff]  ;;  %v388_v40 = vld [vmem:[%s908_s7 + $0x58] sm:$0xff]  ;;  %v389_v42 = vld [vmem:[%s908_s7 + $0x60] sm:$0xff] }
  0x8e   :  { %v641_v41 = vpack.c.bf16 %v388_v40, %v387_v39 }
  0x8f   :  { %v95_v43 = vpop.permute.xlu1 %94  ;;  %v99_v44 = vpop.permute.xlu0 %98 }
  0x90   :  { %v105_v47 = vmul.f32 %v104_v37, %v95_v43  ;;  %v106_v48 = vmul.f32 %v104_v37, %v99_v44  ;;  %v386_v37 = vld [vmem:[%s908_s7 + $0x48] sm:$0xff] }
  0x91   :  { %v637_v38 = vpack.c.bf16 %v386_v37, %v385_v36  ;;  %v390_v43 = vld [vmem:[%s908_s7 + $0x68] sm:$0xff] }
  0x92   :  { %v107_v49 = vadd.f32 %v105_v47, %v91_v46  ;;  %v108_v50 = vadd.f32 %v106_v48, %v92_v45  ;;  %v645_v44 = vpack.c.bf16 %v390_v43, %v389_v42  ;;  %v391_v45 = vld [vmem:[%s908_s7 + $0x70] sm:$0xff]  ;;  %v392_v46 = vld [vmem:[%s908_s7 + $0x78] sm:$0xff]  ;;  %v498_v48 = vld [vmem:[%s909_s6] ss:$0 sm:$0xff] }
  0x93   :  { %v649_v47 = vpack.c.bf16 %v392_v46, %v391_v45 }
  0x94   :  { %v485_v51 = vmul.f32 -1.442695, %v107_v49  ;;  %v486_v52 = vmul.f32 -1.442695, %v108_v50 }
  0x96   :  { %681 = vpow2.f32 %v485_v51 }
  0x97   :  { %683 = vpow2.f32 %v486_v52 }
  0xa0   :  { %v682_v53 = vpop.eup %681 }
  0xa1   :  { %v684_v54 = vpop.eup %683  ;;  %v115_v55 = vadd.f32 1.0, %v682_v53 }
  0xa2   :  { %v116_v56 = vadd.f32 1.0, %v684_v54 }
  0xa3   :  { %685 = vrcp.f32 %v115_v55 }
  0xa4   :  { %687 = vrcp.f32 %v116_v56 }
  0xad   :  { %v686_v57 = vpop.eup %685 }
  0xae   :  { %v688_v58 = vpop.eup %687  ;;  %v121_v59 = vmul.f32 %v686_v57, %v107_v49 }
  0xaf   :  { %v122_v60 = vmul.f32 %v688_v58, %v108_v50 }
  0xb1   :  { %v123_v61 = vpack.c.bf16 %v122_v60, %v121_v59 }
  0xb3   :  { %563 = vmatmul.mubr.bf16.vlgmr.msra.gmra.mrb[0].mxu0 %v123_v61 }
  0xb4   :  { %624 = vmatpush3.bf16.msra.mxu0 %v621_v26 }
  0xb5   :  { %626 = vmatprep.subr.bf16.mxu0 %v625_v29 }
  0xb8   :  { %628 = vmatpush3.bf16.msra.mxu0 %v625_v29 }
  0xb9   :  { %630 = vmatprep.subr.bf16.mxu0 %v629_v32 }
  0xbc   :  { %632 = vmatpush3.bf16.msra.mxu0 %v629_v32 }
  0xbd   :  { %634 = vmatprep.subr.bf16.mxu0 %v633_v35 }
  0xc0   :  { %636 = vmatpush3.bf16.msra.mxu0 %v633_v35 }
  0xc1   :  { %638 = vmatprep.subr.bf16.mxu0 %v637_v38 }
  0xc4   :  { %640 = vmatpush3.bf16.msra.mxu0 %v637_v38 }
  0xc5   :  { %642 = vmatprep.subr.bf16.mxu0 %v641_v41 }
  0xc8   :  { %644 = vmatpush3.bf16.msra.mxu0 %v641_v41 }
  0xc9   :  { %646 = vmatprep.subr.bf16.mxu0 %v645_v44 }
  0xcc   :  { %648 = vmatpush3.bf16.msra.mxu0 %v645_v44 }
  0xcd   :  { %650 = vmatprep.subr.bf16.mxu0 %v649_v47 }
  0xd0   :  { %652 = vmatpush3.bf16.msra.mxu0 %v649_v47 }
 0x186   :  { %v229_v8 = vpop.f32.mrb[0].mxu0 }
 0x187   :  { %v230_v9 = vadd.f32 %v487_v6, %v229_v8  ;;  %v564_v10 = vpop.f32.mrb[1].mxu0 }
 0x188   :  { %v232_v11 = vpop.f32.mrb[2].mxu0 }
 0x189   :  { %v496_v12 = vmul.f32 -1.442695, %v230_v9  ;;  %v233_v13 = vadd.f32 %v487_v6, %v232_v11  ;;  %v565_v14 = vpop.f32.mrb[3].mxu0 }
 0x18b   :  { %689 = vpow2.f32 %v496_v12  ;;  %v497_v15 = vmul.f32 -1.442695, %v233_v13 }
 0x18d   :  { %691 = vpow2.f32 %v497_v15 }
 0x195   :  { %v690_v7 = vpop.eup %689 }
 0x196   :  { %v242_v16 = vadd.f32 1.0, %v690_v7 }
 0x197   :  { %v692_v17 = vpop.eup %691 }
 0x198   :  { %693 = vrcp.f32 %v242_v16  ;;  %v243_v18 = vadd.f32 1.0, %v692_v17 }
 0x19a   :  { %695 = vrcp.f32 %v243_v18 }
 0x1a2   :  { %v694_v19 = vpop.eup %693 }
 0x1a3   :  { %v248_v21 = vmul.f32 %v694_v19, %v230_v9 }
 0x1a4   :  { %v696_v20 = vpop.eup %695 }
 0x1a5   :  { %v249_v22 = vmul.f32 %v696_v20, %v233_v13 }
 0x1a7   :  { %v250_v23 = vpack.c.bf16 %v249_v22, %v248_v21 }
 0x1a9   :  { %583 = vmatmul.mubr.bf16.vlgmr.msra.gmra.mrb[0].mxu1 %v250_v23 }
 0x27c   :  { %v356_v49 = vpop.f32.mrb[0].mxu1 }
 0x27d   :  { %v357_v50 = vadd.f32 %v498_v48, %v356_v49  ;;  %v584_v51 = vpop.f32.mrb[1].mxu1 }
 0x27e   :  { %v359_v52 = vpop.f32.mrb[2].mxu1 }
 0x27f   :  { %v507_v53 = vmul.f32 -1.442695, %v357_v50  ;;  %v360_v54 = vadd.f32 %v498_v48, %v359_v52  ;;  %v585_v55 = vpop.f32.mrb[3].mxu1 }
 0x281   :  { %697 = vpow2.f32 %v507_v53  ;;  %v508_v56 = vmul.f32 -1.442695, %v360_v54 }
 0x283   :  { %699 = vpow2.f32 %v508_v56 }
 0x28b   :  { %v698_v57 = vpop.eup %697 }
 0x28c   :  { %v369_v58 = vadd.f32 1.0, %v698_v57 }
 0x28d   :  { %v700_v59 = vpop.eup %699 }
 0x28e   :  { %701 = vrcp.f32 %v369_v58  ;;  %v370_v60 = vadd.f32 1.0, %v700_v59 }
 0x290   :  { %703 = vrcp.f32 %v370_v60 }
 0x298   :  { %v702_v61 = vpop.eup %701 }
 0x299   :  { %v375_v62 = vmul.f32 %v702_v61, %v357_v50 }
 0x29a   :  { %v704_v63 = vpop.eup %703 }
 0x29b   :  { %v376_v0 = vmul.f32 %v704_v63, %v360_v54  ;;  %618 = vmatprep.mubr.f32.mxu0 %v375_v62 }
 0x29d   :  { %619 = vmatmul.mubr.f32.vlgmr.msra.gmra.mrb[4].mxu0 %v376_v0 }
 0x370   :  { %v620_v2 = vpop.f32.mrb[4].mxu0 }
 0x371   :  { %v476_v3 = vadd.f32 %v620_v2, %v509_v1  ;;  %v459_v4 = vpop.f32.mrb[5].mxu0 }
 0x372   :  { %v475_v5 = vadd.f32 %v509_v1, %v459_v4 }
 0x373   :  { %479 = vst.msk [vmem:[%s911_s9 + $0x8] sm:$0xff] %vm477_vm1, %v476_v3 }
 0x374   :  { %478 = vst.msk [vmem:[%s911_s9] sm:$0xff] %vm477_vm1, %v475_v5 }

</bundles_post_ra>
